<compile_context>
chip_gen: v7x
topology: tpu7x:2x2x1
jax: 0.10.0
libtpu: 0.0.40
codegen_flags: <defaults>
</compile_context>

<pallas_src>
import jax
import jax.numpy as jnp
from jax import lax
from jax.experimental import pallas as pl
from jax.experimental.pallas import tpu as pltpu


def deep_cbow_kernel(tokens_ref, emb_ref, w1_ref, b1_ref, w2_ref, b2_ref,
                     w3_ref, b3_ref, out_ref, x_ref):
    """Fused embedding-gather + 3-layer MLP + CBOW sum.

    tokens_ref: (B*T,) int32 in SMEM
    emb_ref   : (V, 1, E) f32 in VMEM (leading-dim gather layout)
    w*/b*     : weights/biases in VMEM; W3/b3 pre-padded to 128 lanes
    out_ref   : (B, 128) f32 lane-dense logits (caller slices [:, :O])
    x_ref     : (B*T, E) f32 VMEM scratch for the gathered embeddings
    """
    BT, _ = x_ref.shape
    B = out_ref.shape[0]
    T = BT // B

    # --- fused embedding gather (tokens from SMEM, table VMEM-resident) -----
    # BT is tiny and static -> fully unrolled; each row is a (1, E) copy.
    for i in range(BT):
        tok = tokens_ref[i]
        x_ref[pl.ds(i, 1), :] = emb_ref[tok]          # (1, E) <- (1, E)

    x = x_ref[...]                                    # (BT, E)

    # --- token-wise MLP (MXU matmuls, f32 accumulation) ----------------------
    h = jnp.tanh(jnp.dot(x, w1_ref[...], preferred_element_type=jnp.float32)
                 + b1_ref[...])
    h = jnp.tanh(jnp.dot(h, w2_ref[...], preferred_element_type=jnp.float32)
                 + b2_ref[...])                       # (BT, H)

    # --- CBOW reduction hoisted above the final affine layer -----------------
    #   sum_t (h_t @ W3 + b3) == (sum_t h_t) @ W3 + T * b3
    # Segment-sum over tokens via a tiny block-diagonal ones matmul (MXU),
    # which avoids a (BT,H)->(B,T,H) relayout and an XLU sublane reduce.
    i_idx = lax.broadcasted_iota(jnp.int32, (B, BT), 1)
    b_idx = lax.broadcasted_iota(jnp.int32, (B, BT), 0)
    seg = ((i_idx >= b_idx * T) & (i_idx < (b_idx + 1) * T)).astype(jnp.float32)
    h_sum = jnp.dot(seg, h, preferred_element_type=jnp.float32)       # (B, H)

    out_ref[...] = (jnp.dot(h_sum, w3_ref[...],
                            preferred_element_type=jnp.float32)
                    + T * b3_ref[...])                # lane-dense (B, 128)


def deep_cbow_forward(tokens, embedding, w1, b1, w2, b2, w3, b3):
    """tokens: (B, T) int32. Returns (B, O) f32 logits."""
    B, T = tokens.shape
    V, E = embedding.shape
    H = w1.shape[1]
    O = w3.shape[1]
    BT = B * T
    OPAD = 128                                        # lane-dense output width

    # Wrapper-side layout plumbing (free): flatten tokens, leading-dim gather
    # layout for the embedding table, zero-pad the final layer to 128 lanes.
    tokens_flat = tokens.reshape(BT).astype(jnp.int32)
    emb3 = embedding.reshape(V, 1, E)
    w3p = jnp.zeros((H, OPAD), w3.dtype).at[:, :O].set(w3)
    b3p = jnp.zeros((1, OPAD), b3.dtype).at[:, :O].set(b3)

    # Single ungridded invocation: whole problem fits comfortably in VMEM, so
    # no BlockSpec pipelining / double-buffering machinery is wanted.
    # TODO(synk): when B*T grows, tile the flattened token axis
    # (grid=(pl.cdiv(B*T, tm),), tm>=512, weights at constant block index) and
    # DMA-gather embedding rows from an HBM-resident table.
    out_padded = pl.pallas_call(
        deep_cbow_kernel,
        out_shape=jax.ShapeDtypeStruct((B, OPAD), jnp.float32),
        in_specs=[
            pl.BlockSpec(memory_space=pltpu.MemorySpace.SMEM),   # tokens
            pl.BlockSpec(memory_space=pltpu.MemorySpace.VMEM),   # embedding
            pl.BlockSpec(memory_space=pltpu.MemorySpace.VMEM),   # w1
            pl.BlockSpec(memory_space=pltpu.MemorySpace.VMEM),   # b1
            pl.BlockSpec(memory_space=pltpu.MemorySpace.VMEM),   # w2
            pl.BlockSpec(memory_space=pltpu.MemorySpace.VMEM),   # b2
            pl.BlockSpec(memory_space=pltpu.MemorySpace.VMEM),   # w3 (padded)
            pl.BlockSpec(memory_space=pltpu.MemorySpace.VMEM),   # b3 (padded)
        ],
        out_specs=pl.BlockSpec(memory_space=pltpu.MemorySpace.VMEM),
        scratch_shapes=[pltpu.VMEM((BT, E), jnp.float32)],
    )(tokens_flat, emb3, w1, b1, w2, b2, w3p, b3p)

    return out_padded[:, :O]


def reference_forward(tokens, embedding, w1, b1, w2, b2, w3, b3):
    x = embedding[tokens]                             # (B, T, E)
    h = jnp.tanh(x @ w1 + b1[0])
    h = jnp.tanh(h @ w2 + b2[0])
    logits = h @ w3 + b3[0]
    return logits.sum(axis=1)


if __name__ == "__main__":
    # Small deterministic configuration.
    vocab_size = 50
    embedding_dim = 32
    hidden_dim = 32
    output_dim = 5
    batch, seq = 2, 8

    key = jax.random.PRNGKey(0)
    k_emb, k_tok, k1, k2, k3, kb1, kb2, kb3 = jax.random.split(key, 8)

    # Parameters (deterministic synthetic init; shapes match the PyTorch module).
    embedding = jax.random.normal(k_emb, (vocab_size, embedding_dim),
                                  dtype=jnp.float32)
    w1 = jax.random.uniform(k1, (embedding_dim, hidden_dim),
                            minval=-0.1, maxval=0.1, dtype=jnp.float32)
    b1 = jax.random.uniform(kb1, (1, hidden_dim),
                            minval=-0.1, maxval=0.1, dtype=jnp.float32)
    w2 = jax.random.uniform(k2, (hidden_dim, hidden_dim),
                            minval=-0.1, maxval=0.1, dtype=jnp.float32)
    b2 = jax.random.uniform(kb2, (1, hidden_dim),
                            minval=-0.1, maxval=0.1, dtype=jnp.float32)
    w3 = jax.random.uniform(k3, (hidden_dim, output_dim),
                            minval=-0.1, maxval=0.1, dtype=jnp.float32)
    b3 = jax.random.uniform(kb3, (1, output_dim),
                            minval=-0.1, maxval=0.1, dtype=jnp.float32)

    # Inputs: integer token ids, shape [B, T].
    tokens = jax.random.randint(k_tok, (batch, seq), 0, vocab_size,
                                dtype=jnp.int32)

    logits = deep_cbow_forward(tokens, embedding, w1, b1, w2, b2, w3, b3)
    logits = jax.block_until_ready(logits)

    ref = reference_forward(tokens, embedding, w1, b1, w2, b2, w3, b3)
    assert logits.shape == (batch, output_dim)
    assert jnp.allclose(logits, ref, atol=1e-4, rtol=1e-4)

    print("KERNEL_OK")
</pallas_src>

<mosaic_0001>
module attributes {stable_mosaic.version = 11 : i64} {
  func.func @deep_cbow_kernel(%arg0: memref<16xi32, #tpu.memory_space<smem>>, %arg1: memref<50x1x32xf32, #tpu.memory_space<vmem>>, %arg2: memref<32x32xf32, #tpu.memory_space<vmem>>, %arg3: memref<1x32xf32, #tpu.memory_space<vmem>>, %arg4: memref<32x32xf32, #tpu.memory_space<vmem>>, %arg5: memref<1x32xf32, #tpu.memory_space<vmem>>, %arg6: memref<32x128xf32, #tpu.memory_space<vmem>>, %arg7: memref<1x128xf32, #tpu.memory_space<vmem>>, %arg8: memref<2x128xf32, #tpu.memory_space<vmem>>, %arg9: memref<16x32xf32, #tpu.memory_space<vmem>>) attributes {dimension_semantics = [], scalar_prefetch = 0 : i64, scratch_operands = 1 : i64, tpu.core_type = #tpu.core_type<tc>} {
    %c0 = arith.constant 0 : index
    %0 = memref.load %arg0[%c0] : memref<16xi32, #tpu.memory_space<smem>>
    %1 = arith.index_cast %0 : i32 to index
    %c0_0 = arith.constant 0 : index
    %c0_1 = arith.constant 0 : index
    %2 = vector.load %arg1[%1, %c0_0, %c0_1] : memref<50x1x32xf32, #tpu.memory_space<vmem>>, vector<1x1x32xf32>
    %3 = vector.shape_cast %2 : vector<1x1x32xf32> to vector<1x32xf32>
    %c0_2 = arith.constant 0 : index
    %c0_3 = arith.constant 0 : index
    %4 = vector.load %arg9[%c0_2, %c0_3] : memref<16x32xf32, #tpu.memory_space<vmem>>, vector<1x32xf32>
    tpu.vector_store %arg9[%c0_2, %c0_3], %3 {strides = array<i32>} : memref<16x32xf32, #tpu.memory_space<vmem>>, vector<1x32xf32>,
    %c1 = arith.constant 1 : index
    %5 = memref.load %arg0[%c1] : memref<16xi32, #tpu.memory_space<smem>>
    %6 = arith.index_cast %5 : i32 to index
    %c0_4 = arith.constant 0 : index
    %c0_5 = arith.constant 0 : index
    %7 = vector.load %arg1[%6, %c0_4, %c0_5] : memref<50x1x32xf32, #tpu.memory_space<vmem>>, vector<1x1x32xf32>
    %8 = vector.shape_cast %7 : vector<1x1x32xf32> to vector<1x32xf32>
    %c1_6 = arith.constant 1 : index
    %c0_7 = arith.constant 0 : index
    %9 = vector.load %arg9[%c1_6, %c0_7] : memref<16x32xf32, #tpu.memory_space<vmem>>, vector<1x32xf32>
    tpu.vector_store %arg9[%c1_6, %c0_7], %8 {strides = array<i32>} : memref<16x32xf32, #tpu.memory_space<vmem>>, vector<1x32xf32>,
    %c2 = arith.constant 2 : index
    %10 = memref.load %arg0[%c2] : memref<16xi32, #tpu.memory_space<smem>>
    %11 = arith.index_cast %10 : i32 to index
    %c0_8 = arith.constant 0 : index
    %c0_9 = arith.constant 0 : index
    %12 = vector.load %arg1[%11, %c0_8, %c0_9] : memref<50x1x32xf32, #tpu.memory_space<vmem>>, vector<1x1x32xf32>
    %13 = vector.shape_cast %12 : vector<1x1x32xf32> to vector<1x32xf32>
    %c2_10 = arith.constant 2 : index
    %c0_11 = arith.constant 0 : index
    %14 = vector.load %arg9[%c2_10, %c0_11] : memref<16x32xf32, #tpu.memory_space<vmem>>, vector<1x32xf32>
    tpu.vector_store %arg9[%c2_10, %c0_11], %13 {strides = array<i32>} : memref<16x32xf32, #tpu.memory_space<vmem>>, vector<1x32xf32>,
    %c3 = arith.constant 3 : index
    %15 = memref.load %arg0[%c3] : memref<16xi32, #tpu.memory_space<smem>>
    %16 = arith.index_cast %15 : i32 to index
    %c0_12 = arith.constant 0 : index
    %c0_13 = arith.constant 0 : index
    %17 = vector.load %arg1[%16, %c0_12, %c0_13] : memref<50x1x32xf32, #tpu.memory_space<vmem>>, vector<1x1x32xf32>
    %18 = vector.shape_cast %17 : vector<1x1x32xf32> to vector<1x32xf32>
    %c3_14 = arith.constant 3 : index
    %c0_15 = arith.constant 0 : index
    %19 = vector.load %arg9[%c3_14, %c0_15] : memref<16x32xf32, #tpu.memory_space<vmem>>, vector<1x32xf32>
    tpu.vector_store %arg9[%c3_14, %c0_15], %18 {strides = array<i32>} : memref<16x32xf32, #tpu.memory_space<vmem>>, vector<1x32xf32>,
    %c4 = arith.constant 4 : index
    %20 = memref.load %arg0[%c4] : memref<16xi32, #tpu.memory_space<smem>>
    %21 = arith.index_cast %20 : i32 to index
    %c0_16 = arith.constant 0 : index
    %c0_17 = arith.constant 0 : index
    %22 = vector.load %arg1[%21, %c0_16, %c0_17] : memref<50x1x32xf32, #tpu.memory_space<vmem>>, vector<1x1x32xf32>
    %23 = vector.shape_cast %22 : vector<1x1x32xf32> to vector<1x32xf32>
    %c4_18 = arith.constant 4 : index
    %c0_19 = arith.constant 0 : index
    %24 = vector.load %arg9[%c4_18, %c0_19] : memref<16x32xf32, #tpu.memory_space<vmem>>, vector<1x32xf32>
    tpu.vector_store %arg9[%c4_18, %c0_19], %23 {strides = array<i32>} : memref<16x32xf32, #tpu.memory_space<vmem>>, vector<1x32xf32>,
    %c5 = arith.constant 5 : index
    %25 = memref.load %arg0[%c5] : memref<16xi32, #tpu.memory_space<smem>>
    %26 = arith.index_cast %25 : i32 to index
    %c0_20 = arith.constant 0 : index
    %c0_21 = arith.constant 0 : index
    %27 = vector.load %arg1[%26, %c0_20, %c0_21] : memref<50x1x32xf32, #tpu.memory_space<vmem>>, vector<1x1x32xf32>
    %28 = vector.shape_cast %27 : vector<1x1x32xf32> to vector<1x32xf32>
    %c5_22 = arith.constant 5 : index
    %c0_23 = arith.constant 0 : index
    %29 = vector.load %arg9[%c5_22, %c0_23] : memref<16x32xf32, #tpu.memory_space<vmem>>, vector<1x32xf32>
    tpu.vector_store %arg9[%c5_22, %c0_23], %28 {strides = array<i32>} : memref<16x32xf32, #tpu.memory_space<vmem>>, vector<1x32xf32>,
    %c6 = arith.constant 6 : index
    %30 = memref.load %arg0[%c6] : memref<16xi32, #tpu.memory_space<smem>>
    %31 = arith.index_cast %30 : i32 to index
    %c0_24 = arith.constant 0 : index
    %c0_25 = arith.constant 0 : index
    %32 = vector.load %arg1[%31, %c0_24, %c0_25] : memref<50x1x32xf32, #tpu.memory_space<vmem>>, vector<1x1x32xf32>
    %33 = vector.shape_cast %32 : vector<1x1x32xf32> to vector<1x32xf32>
    %c6_26 = arith.constant 6 : index
    %c0_27 = arith.constant 0 : index
    %34 = vector.load %arg9[%c6_26, %c0_27] : memref<16x32xf32, #tpu.memory_space<vmem>>, vector<1x32xf32>
    tpu.vector_store %arg9[%c6_26, %c0_27], %33 {strides = array<i32>} : memref<16x32xf32, #tpu.memory_space<vmem>>, vector<1x32xf32>,
    %c7 = arith.constant 7 : index
    %35 = memref.load %arg0[%c7] : memref<16xi32, #tpu.memory_space<smem>>
    %36 = arith.index_cast %35 : i32 to index
    %c0_28 = arith.constant 0 : index
    %c0_29 = arith.constant 0 : index
    %37 = vector.load %arg1[%36, %c0_28, %c0_29] : memref<50x1x32xf32, #tpu.memory_space<vmem>>, vector<1x1x32xf32>
    %38 = vector.shape_cast %37 : vector<1x1x32xf32> to vector<1x32xf32>
    %c7_30 = arith.constant 7 : index
    %c0_31 = arith.constant 0 : index
    %39 = vector.load %arg9[%c7_30, %c0_31] : memref<16x32xf32, #tpu.memory_space<vmem>>, vector<1x32xf32>
    tpu.vector_store %arg9[%c7_30, %c0_31], %38 {strides = array<i32>} : memref<16x32xf32, #tpu.memory_space<vmem>>, vector<1x32xf32>,
    %c8 = arith.constant 8 : index
    %40 = memref.load %arg0[%c8] : memref<16xi32, #tpu.memory_space<smem>>
    %41 = arith.index_cast %40 : i32 to index
    %c0_32 = arith.constant 0 : index
    %c0_33 = arith.constant 0 : index
    %42 = vector.load %arg1[%41, %c0_32, %c0_33] : memref<50x1x32xf32, #tpu.memory_space<vmem>>, vector<1x1x32xf32>
    %43 = vector.shape_cast %42 : vector<1x1x32xf32> to vector<1x32xf32>
    %c8_34 = arith.constant 8 : index
    %c0_35 = arith.constant 0 : index
    %44 = vector.load %arg9[%c8_34, %c0_35] : memref<16x32xf32, #tpu.memory_space<vmem>>, vector<1x32xf32>
    tpu.vector_store %arg9[%c8_34, %c0_35], %43 {strides = array<i32>} : memref<16x32xf32, #tpu.memory_space<vmem>>, vector<1x32xf32>,
    %c9 = arith.constant 9 : index
    %45 = memref.load %arg0[%c9] : memref<16xi32, #tpu.memory_space<smem>>
    %46 = arith.index_cast %45 : i32 to index
    %c0_36 = arith.constant 0 : index
    %c0_37 = arith.constant 0 : index
    %47 = vector.load %arg1[%46, %c0_36, %c0_37] : memref<50x1x32xf32, #tpu.memory_space<vmem>>, vector<1x1x32xf32>
    %48 = vector.shape_cast %47 : vector<1x1x32xf32> to vector<1x32xf32>
    %c9_38 = arith.constant 9 : index
    %c0_39 = arith.constant 0 : index
    %49 = vector.load %arg9[%c9_38, %c0_39] : memref<16x32xf32, #tpu.memory_space<vmem>>, vector<1x32xf32>
    tpu.vector_store %arg9[%c9_38, %c0_39], %48 {strides = array<i32>} : memref<16x32xf32, #tpu.memory_space<vmem>>, vector<1x32xf32>,
    %c10 = arith.constant 10 : index
    %50 = memref.load %arg0[%c10] : memref<16xi32, #tpu.memory_space<smem>>
    %51 = arith.index_cast %50 : i32 to index
    %c0_40 = arith.constant 0 : index
    %c0_41 = arith.constant 0 : index
    %52 = vector.load %arg1[%51, %c0_40, %c0_41] : memref<50x1x32xf32, #tpu.memory_space<vmem>>, vector<1x1x32xf32>
    %53 = vector.shape_cast %52 : vector<1x1x32xf32> to vector<1x32xf32>
    %c10_42 = arith.constant 10 : index
    %c0_43 = arith.constant 0 : index
    %54 = vector.load %arg9[%c10_42, %c0_43] : memref<16x32xf32, #tpu.memory_space<vmem>>, vector<1x32xf32>
    tpu.vector_store %arg9[%c10_42, %c0_43], %53 {strides = array<i32>} : memref<16x32xf32, #tpu.memory_space<vmem>>, vector<1x32xf32>,
    %c11 = arith.constant 11 : index
    %55 = memref.load %arg0[%c11] : memref<16xi32, #tpu.memory_space<smem>>
    %56 = arith.index_cast %55 : i32 to index
    %c0_44 = arith.constant 0 : index
    %c0_45 = arith.constant 0 : index
    %57 = vector.load %arg1[%56, %c0_44, %c0_45] : memref<50x1x32xf32, #tpu.memory_space<vmem>>, vector<1x1x32xf32>
    %58 = vector.shape_cast %57 : vector<1x1x32xf32> to vector<1x32xf32>
    %c11_46 = arith.constant 11 : index
    %c0_47 = arith.constant 0 : index
    %59 = vector.load %arg9[%c11_46, %c0_47] : memref<16x32xf32, #tpu.memory_space<vmem>>, vector<1x32xf32>
    tpu.vector_store %arg9[%c11_46, %c0_47], %58 {strides = array<i32>} : memref<16x32xf32, #tpu.memory_space<vmem>>, vector<1x32xf32>,
    %c12 = arith.constant 12 : index
    %60 = memref.load %arg0[%c12] : memref<16xi32, #tpu.memory_space<smem>>
    %61 = arith.index_cast %60 : i32 to index
    %c0_48 = arith.constant 0 : index
    %c0_49 = arith.constant 0 : index
    %62 = vector.load %arg1[%61, %c0_48, %c0_49] : memref<50x1x32xf32, #tpu.memory_space<vmem>>, vector<1x1x32xf32>
    %63 = vector.shape_cast %62 : vector<1x1x32xf32> to vector<1x32xf32>
    %c12_50 = arith.constant 12 : index
    %c0_51 = arith.constant 0 : index
    %64 = vector.load %arg9[%c12_50, %c0_51] : memref<16x32xf32, #tpu.memory_space<vmem>>, vector<1x32xf32>
    tpu.vector_store %arg9[%c12_50, %c0_51], %63 {strides = array<i32>} : memref<16x32xf32, #tpu.memory_space<vmem>>, vector<1x32xf32>,
    %c13 = arith.constant 13 : index
    %65 = memref.load %arg0[%c13] : memref<16xi32, #tpu.memory_space<smem>>
    %66 = arith.index_cast %65 : i32 to index
    %c0_52 = arith.constant 0 : index
    %c0_53 = arith.constant 0 : index
    %67 = vector.load %arg1[%66, %c0_52, %c0_53] : memref<50x1x32xf32, #tpu.memory_space<vmem>>, vector<1x1x32xf32>
    %68 = vector.shape_cast %67 : vector<1x1x32xf32> to vector<1x32xf32>
    %c13_54 = arith.constant 13 : index
    %c0_55 = arith.constant 0 : index
    %69 = vector.load %arg9[%c13_54, %c0_55] : memref<16x32xf32, #tpu.memory_space<vmem>>, vector<1x32xf32>
    tpu.vector_store %arg9[%c13_54, %c0_55], %68 {strides = array<i32>} : memref<16x32xf32, #tpu.memory_space<vmem>>, vector<1x32xf32>,
    %c14 = arith.constant 14 : index
    %70 = memref.load %arg0[%c14] : memref<16xi32, #tpu.memory_space<smem>>
    %71 = arith.index_cast %70 : i32 to index
    %c0_56 = arith.constant 0 : index
    %c0_57 = arith.constant 0 : index
    %72 = vector.load %arg1[%71, %c0_56, %c0_57] : memref<50x1x32xf32, #tpu.memory_space<vmem>>, vector<1x1x32xf32>
    %73 = vector.shape_cast %72 : vector<1x1x32xf32> to vector<1x32xf32>
    %c14_58 = arith.constant 14 : index
    %c0_59 = arith.constant 0 : index
    %74 = vector.load %arg9[%c14_58, %c0_59] : memref<16x32xf32, #tpu.memory_space<vmem>>, vector<1x32xf32>
    tpu.vector_store %arg9[%c14_58, %c0_59], %73 {strides = array<i32>} : memref<16x32xf32, #tpu.memory_space<vmem>>, vector<1x32xf32>,
    %c15 = arith.constant 15 : index
    %75 = memref.load %arg0[%c15] : memref<16xi32, #tpu.memory_space<smem>>
    %76 = arith.index_cast %75 : i32 to index
    %c0_60 = arith.constant 0 : index
    %c0_61 = arith.constant 0 : index
    %77 = vector.load %arg1[%76, %c0_60, %c0_61] : memref<50x1x32xf32, #tpu.memory_space<vmem>>, vector<1x1x32xf32>
    %78 = vector.shape_cast %77 : vector<1x1x32xf32> to vector<1x32xf32>
    %c15_62 = arith.constant 15 : index
    %c0_63 = arith.constant 0 : index
    %79 = vector.load %arg9[%c15_62, %c0_63] : memref<16x32xf32, #tpu.memory_space<vmem>>, vector<1x32xf32>
    tpu.vector_store %arg9[%c15_62, %c0_63], %78 {strides = array<i32>} : memref<16x32xf32, #tpu.memory_space<vmem>>, vector<1x32xf32>,
    %c0_64 = arith.constant 0 : index
    %c0_65 = arith.constant 0 : index
    %80 = vector.load %arg9[%c0_64, %c0_65] : memref<16x32xf32, #tpu.memory_space<vmem>>, vector<16x32xf32>
    %c0_66 = arith.constant 0 : index
    %c0_67 = arith.constant 0 : index
    %81 = vector.load %arg2[%c0_66, %c0_67] : memref<32x32xf32, #tpu.memory_space<vmem>>, vector<32x32xf32>
    %cst = arith.constant dense<0.000000e+00> : vector<16x32xf32>
    %82 = tpu.matmul %80, %81, %cst {dimension_numbers = #tpu.dot_dimension_numbers<[1], [0], [0], [1], [0, 0, 1, 1], [], []>} : vector<16x32xf32>, vector<32x32xf32>, vector<16x32xf32> -> vector<16x32xf32>
    %c0_68 = arith.constant 0 : index
    %c0_69 = arith.constant 0 : index
    %83 = vector.load %arg3[%c0_68, %c0_69] : memref<1x32xf32, #tpu.memory_space<vmem>>, vector<1x32xf32>
    %84 = vector.broadcast %83 : vector<1x32xf32> to vector<16x32xf32>
    %85 = arith.addf %82, %84 : vector<16x32xf32>
    %86 = math.tanh %85 : vector<16x32xf32>
    %c0_70 = arith.constant 0 : index
    %c0_71 = arith.constant 0 : index
    %87 = vector.load %arg4[%c0_70, %c0_71] : memref<32x32xf32, #tpu.memory_space<vmem>>, vector<32x32xf32>
    %cst_72 = arith.constant dense<0.000000e+00> : vector<16x32xf32>
    %88 = tpu.matmul %86, %87, %cst_72 {dimension_numbers = #tpu.dot_dimension_numbers<[1], [0], [0], [1], [0, 0, 1, 1], [], []>} : vector<16x32xf32>, vector<32x32xf32>, vector<16x32xf32> -> vector<16x32xf32>
    %c0_73 = arith.constant 0 : index
    %c0_74 = arith.constant 0 : index
    %89 = vector.load %arg5[%c0_73, %c0_74] : memref<1x32xf32, #tpu.memory_space<vmem>>, vector<1x32xf32>
    %90 = vector.broadcast %89 : vector<1x32xf32> to vector<16x32xf32>
    %91 = arith.addf %88, %90 : vector<16x32xf32>
    %92 = math.tanh %91 : vector<16x32xf32>
    %93 = tpu.iota {dimensions = array<i32: 1>} : vector<2x16xi32>
    %94 = tpu.iota {dimensions = array<i32: 0>} : vector<2x16xi32>
    %c8_i32 = arith.constant 8 : i32
    %95 = vector.broadcast %c8_i32 : i32 to vector<2x16xi32>
    %96 = arith.muli %94, %95 : vector<2x16xi32>
    %97 = arith.cmpi sge, %93, %96 : vector<2x16xi32>
    %c1_i32 = arith.constant 1 : i32
    %98 = vector.broadcast %c1_i32 : i32 to vector<2x16xi32>
    %99 = arith.addi %94, %98 : vector<2x16xi32>
    %c8_i32_75 = arith.constant 8 : i32
    %100 = vector.broadcast %c8_i32_75 : i32 to vector<2x16xi32>
    %101 = arith.muli %99, %100 : vector<2x16xi32>
    %102 = arith.cmpi slt, %93, %101 : vector<2x16xi32>
    %103 = arith.andi %97, %102 : vector<2x16xi1>
    %104 = arith.extui %103 : vector<2x16xi1> to vector<2x16xi32>
    %105 = arith.sitofp %104 : vector<2x16xi32> to vector<2x16xf32>
    %cst_76 = arith.constant dense<0.000000e+00> : vector<2x32xf32>
    %106 = tpu.matmul %105, %92, %cst_76 {dimension_numbers = #tpu.dot_dimension_numbers<[1], [0], [0], [1], [0, 0, 1, 1], [], []>} : vector<2x16xf32>, vector<16x32xf32>, vector<2x32xf32> -> vector<2x32xf32>
    %c0_77 = arith.constant 0 : index
    %c0_78 = arith.constant 0 : index
    %107 = vector.load %arg6[%c0_77, %c0_78] : memref<32x128xf32, #tpu.memory_space<vmem>>, vector<32x128xf32>
    %cst_79 = arith.constant dense<0.000000e+00> : vector<2x128xf32>
    %108 = tpu.matmul %106, %107, %cst_79 {dimension_numbers = #tpu.dot_dimension_numbers<[1], [0], [0], [1], [0, 0, 1, 1], [], []>} : vector<2x32xf32>, vector<32x128xf32>, vector<2x128xf32> -> vector<2x128xf32>
    %c0_80 = arith.constant 0 : index
    %c0_81 = arith.constant 0 : index
    %109 = vector.load %arg7[%c0_80, %c0_81] : memref<1x128xf32, #tpu.memory_space<vmem>>, vector<1x128xf32>
    %cst_82 = arith.constant 8.000000e+00 : f32
    %110 = vector.broadcast %cst_82 : f32 to vector<1x128xf32>
    %111 = arith.mulf %110, %109 : vector<1x128xf32>
    %112 = vector.broadcast %111 : vector<1x128xf32> to vector<2x128xf32>
    %113 = arith.addf %108, %112 : vector<2x128xf32>
    %c0_83 = arith.constant 0 : index
    %c0_84 = arith.constant 0 : index
    %114 = vector.load %arg8[%c0_83, %c0_84] : memref<2x128xf32, #tpu.memory_space<vmem>>, vector<2x128xf32>
    tpu.vector_store %arg8[%c0_83, %c0_84], %113 {strides = array<i32>} : memref<2x128xf32, #tpu.memory_space<vmem>>, vector<2x128xf32>,
    return
  }
}

</mosaic_0001>

<bundles_post_ra>
// kernel: tpu_custom_call.1
= control target key start
LH: loop header
LB: loop body
LE: loop exit
PB: predicated region body
PF: predicated region fallthrough
CT: control target
= control target key end

     0   :  { %13 = vsyncpa [#allocation6], 0  ;;  %s904_s0 = inlined_call_operand.vmem [shape: s32[16], index: 0, kind: input, shape index: {}]   ;;  %s905_s1 = inlined_call_operand.vmem [shape: f32[50,1,32], index: 1, kind: input, shape index: {}]   ;;  %s906_s2 = inlined_call_operand.vmem [shape: f32[32,32], index: 2, kind: input, shape index: {}]   ;;  %s907_s3 = inlined_call_operand.hbm [shape: f32[1,32], index: 3, kind: input, shape index: {}]   ;;  %s908_s4 = inlined_call_operand.vmem [shape: f32[32,32], index: 4, kind: input, shape index: {}]   ;;  %s909_s5 = inlined_call_operand.vmem [shape: f32[1,32], index: 5, kind: input, shape index: {}]   ;;  %s910_s6 = inlined_call_operand.vmem [shape: f32[32,128], index: 6, kind: input, shape index: {}]   ;;  %s911_s7 = inlined_call_operand.vmem [shape: f32[1,128], index: 7, kind: input, shape index: {}]   ;;  %s912_s8 = inlined_call_operand.hbm [shape: f32[2,128], index: 8, kind: output, shape index: {}]  }
   0x1   :  { %14 = vsyncpa [#allocation4], 0 }
   0x2   :  { %15 = vsyncpa [#allocation5], 0  ;;  %s22_s29 = sshll.u32 %s904_s0, 4  ;;  %s23_s29 = int_to_ptr.vmem [resolvable:$true] %s22_s29 }
   0x3   :  { %s638_s30 = scalar_lea.vmem %s23_s29, 16  ;;  %p643_p1 = scmp.lt.s32.totalorder %s23_s29, %s23_s29 }
   0x4   :  { %p639_p0 = scmp.ne.s32.totalorder %s23_s29, %s638_s30  ;;  %p644_p2 = scmp.lt.s32.totalorder %s638_s30, %s638_s30 }
   0x6   :  { %p645_p3 = por %p644_p2, %p643_p1 }
   0x8   :  { %p646_p4 = pnand %p645_p3, %p639_p0 }
   0xa   :  { %649 = shalt.err (!%p646_p4)
}
   0xb   :  { %s700_s9 = smov [#allocation3]   ;;  %s701_s10 = smov [#allocation7]  }
   0xc   :  { %25 = dma.vmem_to_smem %s23_s29, 16, %s700_s9, [#allocation6]  }
   0xd   :  { %s36_s11 = sshll.u32 %s701_s10, 4  ;;  %s650_s14 = scalar_lea.hbm %s907_s3, 16  ;;  %s37_s11 = int_to_ptr.vmem [resolvable:$true] %s36_s11 }
   0xe   :  { %p651_p5 = scmp.ne.s32.totalorder %s907_s3, %s650_s14  ;;  %p654_p6 = scmp.lt.u32.totalorder %s650_s14, %s907_s3 }
  0x10   :  { %p656_p7 = pnand %p654_p6, %p651_p5 }
  0x12   :  { %659 = shalt.err (!%p656_p7)
}
  0x13   :  { %s660_s18 = scalar_lea.vmem %s37_s11, 16  ;;  %s664_s19 = scalar_lea.vmem %s37_s11, 32 }
  0x14   :  { %p661_p8 = scmp.ne.s32.totalorder %s37_s11, %s660_s18  ;;  %p665_p9 = scmp.lt.s32.totalorder %s37_s11, %s37_s11 }
  0x15   :  { %p666_p10 = scmp.lt.s32.totalorder %s664_s19, %s660_s18 }
  0x17   :  { %p667_p11 = por %p666_p10, %p665_p9 }
  0x19   :  { %p668_p12 = pnand %p667_p11, %p661_p8 }
  0x1b   :  { %671 = shalt.err (!%p668_p12)
}
  0x1c   :  { %39 = dma.hbm_to_vmem [thread:$0]  %s907_s3, 16, %s37_s11, [#allocation4]  }
  0x1d   :  { %694 = dma.done.wait [#allocation6], 16  }
  0x1e   :  { %695 = vsyncadd [#allocation6], 4294967280 }
  0x1f   :  { %696 = dma.done.wait [#allocation4], 16  }
  0x20   :  { %697 = vsyncadd [#allocation4], 4294967280 }
  0x21   :  { %54 = sfence }
  0x22   :  { %v122_v0 = vld [vmem:[%s906_s2] sm:$0xff]  ;;  %v123_v1 = vld [vmem:[%s906_s2 + $0x8] sm:$0xff]  ;;  %v124_v2 = vld [vmem:[%s906_s2 + $0x10] sm:$0xff]  ;;  %s55_s28 = sld [smem:[#allocation3]]  ;;  %s515_s30 = sld [smem:[#allocation3 + $0x1]]  ;;  %vm58_vm0 = vcmask 253952   ;;  %v311_v45 = vlaneseq }
  0x23   :  { %v599_v3 = vpack.c.bf16 %v123_v1, %v122_v0  ;;  %v125_v4 = vld [vmem:[%s906_s2 + $0x18] sm:$0xff]  ;;  %s516_s9 = sld [smem:[#allocation3 + $0x2]]  ;;  %s517_s10 = sld [smem:[#allocation3 + $0x3]]  ;;  %vm133_vm1 = vcmask 261120   ;;  %v217_v24 = vld [vmem:[%s908_s4] sm:$0xff]  ;;  %v218_v25 = vld [vmem:[%s908_s4 + $0x8] sm:$0xff] }
  0x24   :  { %v603_v5 = vpack.c.bf16 %v125_v4, %v124_v2  ;;  %s518_s11 = sld [smem:[#allocation3 + $0x4]]  ;;  %s519_s12 = sld [smem:[#allocation3 + $0x5]]  ;;  %v219_v26 = vld [vmem:[%s908_s4 + $0x10] sm:$0xff]  ;;  %v607_v27 = vpack.c.bf16 %v218_v25, %v217_v24  ;;  %v220_v28 = vld [vmem:[%s908_s4 + $0x18] sm:$0xff]  ;;  %v702_v37 = vmov 0.0|0.0   ;;  %vm703_vm2 = vmmov 0  }
  0x25   :  { %600 = vmatprep.subr.bf16.mxu0 %v599_v3  ;;  %s520_s13 = sld [smem:[#allocation3 + $0x6]]  ;;  %s778_s14 = sld [smem:[#allocation3 + $0x7]]  ;;  %v611_v29 = vpack.c.bf16 %v220_v28, %v219_v26  ;;  %v530_v30 = vld [vmem:[#allocation7] ss:$0 sm:$0xff]  ;;  %v704_v38 = vmov 0.0   ;;  %v397_v39 = vld [vmem:[%s910_s6] sm:$0xff] }
  0x26   :  { %602 = vmatpush3.bf16.msra.mxu0 %v599_v3  ;;  %s780_s15 = sld [smem:[#allocation3 + $0x8]]  ;;  %s782_s16 = sld [smem:[#allocation3 + $0x9]]  ;;  %608 = vmatprep.subr.bf16.mxu1 %v607_v27  ;;  %v398_v40 = vld [vmem:[%s910_s6 + $0x8] sm:$0xff]  ;;  %v399_v41 = vld [vmem:[%s910_s6 + $0x10] sm:$0xff]  ;;  %v400_v43 = vld [vmem:[%s910_s6 + $0x18] sm:$0xff]  ;;  %v314_v47 = vshrl.u32 %v311_v45, 7 }
  0x27   :  { %604 = vmatprep.subr.bf16.mxu0 %v603_v5  ;;  %s784_s0 = sld [smem:[#allocation3 + $0xa]]  ;;  %s789_s19 = sld [smem:[#allocation3 + $0xb]]  ;;  %610 = vmatpush3.bf16.msra.mxu1 %v607_v27  ;;  %v619_v42 = vpack.c.bf16 %v398_v40, %v397_v39  ;;  %v622_v44 = vpack.c.bf16 %v400_v43, %v399_v41  ;;  %v533_v46 = vld [vmem:[%s909_s5] ss:$0 sm:$0xff]  ;;  %v312_v53 = vand.u32 127, %v311_v45  ;;  %vm323_vm6 = vcmask 130048  }
  0x28   :  { %s56_s18 = scalar_lea.vmem %s905_s1, %s55_s28  ;;  %s61_s22 = scalar_lea.vmem %s905_s1, %s515_s30  ;;  %612 = vmatprep.subr.bf16.mxu1 %v611_v29  ;;  %v317_v52 = vadd.s32 1, %v314_v47  ;;  %v315_v54 = vmul.u32 8, %v314_v47  ;;  %v401_v62 = vld [vmem:[%s911_s7] sm:$0x1]  ;;  %v406_v0 = vsub.s32 0, %v314_v47 }
  0x29   :  { %v57_v6 = vld [vmem:[%s56_s18] sm:$0x1]  ;;  %s65_s25 = scalar_lea.vmem %s905_s1, %s516_s9  ;;  %s69_s28 = scalar_lea.vmem %s905_s1, %s517_s10  ;;  %v402_v63 = vmul.f32 8.0, %v401_v62 }
  0x2a   :  { %606 = vmatpush3.bf16.msra.mxu0 %v603_v5  ;;  %59 = vst.msk [vmem:[#allocation2] sm:$0x1] %vm58_vm0, %v57_v6  ;;  %v62_v7 = vld [vmem:[%s61_s22] sm:$0x1]  ;;  %s73_s2 = scalar_lea.vmem %s905_s1, %s518_s11  ;;  %s77_s17 = scalar_lea.vmem %s905_s1, %s519_s12  ;;  %v318_v55 = vmul.u32 8, %v317_v52  ;;  %vm316_vm3 = vcmp.ge.s32.totalorder %v312_v53, %v315_v54 }
  0x2b   :  { %v66_v8 = vld [vmem:[%s65_s25] sm:$0x1]  ;;  %63 = vst.msk [vmem:[#allocation2 + $0x1] sm:$0x1] %vm58_vm0, %v62_v7  ;;  %s81_s10 = scalar_lea.vmem %s905_s1, %s520_s13  ;;  %s85_s22 = scalar_lea.vmem %s905_s1, %s778_s14  ;;  %614 = vmatpush3.bf16.msra.mxu1 %v611_v29  ;;  %615 = vmatprep.subr.bf16.mxu0 %v702_v37  ;;  %v407_v1 = vrot.slane %v402_v63, %v406_v0 }
  0x2c   :  { %67 = vst.msk [vmem:[#allocation2 + $0x2] sm:$0x1] %vm58_vm0, %v66_v8  ;;  %v70_v9 = vld [vmem:[%s69_s28] sm:$0x1]  ;;  %s89_s25 = scalar_lea.vmem %s905_s1, %s780_s15  ;;  %s93_s26 = scalar_lea.vmem %s905_s1, %s782_s16  ;;  %618 = vmatprep.subr.bf16.mxu1 %v702_v37  ;;  %vm319_vm4 = vcmp.lt.s32.totalorder %v312_v53, %v318_v55 }
  0x2d   :  { %v74_v10 = vld [vmem:[%s73_s2] sm:$0x1]  ;;  %71 = vst.msk [vmem:[#allocation2 + $0x3] sm:$0x1] %vm58_vm0, %v70_v9  ;;  %s97_s3 = scalar_lea.vmem %s905_s1, %s784_s0  ;;  %s101_s29 = scalar_lea.vmem %s905_s1, %s789_s19  ;;  %vm320_vm5 = vmand %vm316_vm3, %vm319_vm4 }
  0x2e   :  { %75 = vst.msk [vmem:[#allocation2 + $0x4] sm:$0x1] %vm58_vm0, %v74_v10  ;;  %v78_v11 = vld [vmem:[%s77_s17] sm:$0x1]  ;;  %s526_s2 = sld [smem:[#allocation3 + $0xc]]  ;;  %s527_s16 = sld [smem:[#allocation3 + $0xd]] }
  0x2f   :  { %v82_v12 = vld [vmem:[%s81_s10] sm:$0x1]  ;;  %79 = vst.msk [vmem:[#allocation2 + $0x5] sm:$0x1] %vm58_vm0, %v78_v11  ;;  %s528_s30 = sld [smem:[#allocation3 + $0xe]]  ;;  %s529_s0 = sld [smem:[#allocation3 + $0xf]] }
  0x30   :  { %83 = vst.msk [vmem:[#allocation2 + $0x6] sm:$0x1] %vm58_vm0, %v82_v12  ;;  %v86_v13 = vld [vmem:[%s85_s22] sm:$0x1]  ;;  %v536_v59 = vsel %vm320_vm5, 1.0, %v704_v38  ;;  %s705_s20 = smov [#allocation8]  }
  0x31   :  { %v90_v14 = vld [vmem:[%s89_s25] sm:$0x1]  ;;  %87 = vst.msk [vmem:[#allocation2 + $0x7] sm:$0x1] %vm58_vm0, %v86_v13  ;;  %s489_s19 = sshll.u32 %s705_s20, 4  ;;  %s490_s19 = int_to_ptr.vmem [resolvable:$true] %s489_s19 }
  0x32   :  { %91 = vst.msk [vmem:[#allocation2 + $0x8] sm:$0x1] %vm58_vm0, %v90_v14  ;;  %v94_v15 = vld [vmem:[%s93_s26] sm:$0x1]  ;;  %p677_p0 = scmp.lt.s32.totalorder %s490_s19, %s490_s19 }
  0x33   :  { %v98_v16 = vld [vmem:[%s97_s3] sm:$0x1]  ;;  %95 = vst.msk [vmem:[#allocation2 + $0x9] sm:$0x1] %vm58_vm0, %v94_v15 }
  0x34   :  { %99 = vst.msk [vmem:[#allocation2 + $0xa] sm:$0x1] %vm58_vm0, %v98_v16  ;;  %v102_v17 = vld [vmem:[%s101_s29] sm:$0x1]  ;;  %s105_s18 = scalar_lea.vmem %s905_s1, %s526_s2  ;;  %s109_s10 = scalar_lea.vmem %s905_s1, %s527_s16 }
  0x35   :  { %103 = vst.msk [vmem:[#allocation2 + $0xb] sm:$0x1] %vm58_vm0, %v102_v17  ;;  %v106_v19 = vld [vmem:[%s105_s18] sm:$0x1]  ;;  %s113_s22 = scalar_lea.vmem %s905_s1, %s528_s30  ;;  %s117_s25 = scalar_lea.vmem %s905_s1, %s529_s0 }
  0x36   :  { %107 = vst.msk [vmem:[#allocation2 + $0xc] sm:$0x1] %vm58_vm0, %v106_v19  ;;  %v110_v20 = vld [vmem:[%s109_s10] sm:$0x1]  ;;  %s672_s10 = scalar_lea.vmem %s490_s19, 32 }
  0x37   :  { %v114_v21 = vld [vmem:[%s113_s22] sm:$0x1]  ;;  %111 = vst.msk [vmem:[#allocation2 + $0xd] sm:$0x1] %vm58_vm0, %v110_v20  ;;  %p673_p13 = scmp.ne.s32.totalorder %s490_s19, %s672_s10  ;;  %p678_p1 = scmp.lt.s32.totalorder %s672_s10, %s672_s10 }
  0x38   :  { %v120_v18 = vld [vmem:[#allocation2] sm:$0xff]  ;;  %115 = vst.msk [vmem:[#allocation2 + $0xe] sm:$0x1] %vm58_vm0, %v114_v21 }
  0x39   :  { %567 = vmatprep.mubr.msk.f32.mxu0 %vm133_vm1, %v120_v18  ;;  %v118_v22 = vld [vmem:[%s117_s25] sm:$0x1]  ;;  %p679_p2 = por %p678_p1, %p677_p0 }
  0x3a   :  { %119 = vst.msk [vmem:[#allocation2 + $0xf] sm:$0x1] %vm58_vm0, %v118_v22 }
  0x3b   :  { %p680_p3 = pnand %p679_p2, %p673_p13 }
  0x41   :  { %v121_v23 = vld [vmem:[#allocation2 + $0x8] sm:$0xff] }
  0x42   :  { %568 = vmatmul.mubr.msk.f32.vlgmr.msra.gmra.mrb[0].mxu0 %vm133_vm1, %v121_v23 }
  0x43   :  { %585 = vmatprep.mubr.msk.f32.mxu0 %vm703_vm2, %v704_v38 }
 0x115   :  { %v569_v31 = vpop.f32.mrb[0].mxu0 }
 0x116   :  { %v212_v32 = vadd.f32 %v569_v31, %v530_v30  ;;  %v206_v33 = vpop.f32.mrb[1].mxu0 }
 0x117   :  { %v207_v34 = vadd.f32 %v530_v30, %v206_v33 }
 0x119   :  { %630 = vtanh.f32 %v207_v34 }
 0x11a   :  { %632 = vtanh.f32 %v212_v32 }
 0x123   :  { %v631_v35 = vpop.eup %630 }
 0x124   :  { %v633_v36 = vpop.eup %632  ;;  %578 = vmatprep.mubr.msk.f32.mxu1 %vm133_vm1, %v631_v35 }
 0x125   :  { %579 = vmatmul.mubr.msk.f32.vlgmr.msra.gmra.mrb[0].mxu1 %vm133_vm1, %v633_v36 }
 0x126   :  { %596 = vmatprep.mubr.msk.f32.mxu1 %vm703_vm2, %v704_v38  ;;  %620 = vmatpush3.bf16.msra.mxu1 %v619_v42 }
 0x127   :  { %621 = vmatprep.subr.bf16.mxu1 %v702_v37 }
 0x12a   :  { %623 = vmatpush3.bf16.msra.mxu1 %v622_v44 }
 0x1f8   :  { %v580_v48 = vpop.f32.mrb[0].mxu1 }
 0x1f9   :  { %v306_v49 = vadd.f32 %v580_v48, %v533_v46  ;;  %v300_v50 = vpop.f32.mrb[1].mxu1 }
 0x1fa   :  { %v301_v51 = vadd.f32 %v533_v46, %v300_v50 }
 0x1fb   :  { %634 = vtanh.f32 %v306_v49 }
 0x1fc   :  { %636 = vtanh.f32 %v301_v51 }
 0x205   :  { %v635_v56 = vpop.eup %634 }
 0x206   :  { %v637_v57 = vpop.eup %636 }
 0x207   :  { %v616_v58 = vpack.c.bf16 %v635_v56, %v637_v57 }
 0x209   :  { %617 = vmatpush3.bf16.msra.mxu0 %v616_v58 }
 0x20c   :  { %586 = vmatmul.mubr.msk.f32.vlgmr.msra.gmra.mrb[2].mxu0 %vm323_vm6, %v536_v59 }
 0x2df   :  { %v393_v60 = vpop.f32.mrb[2].mxu0 }
 0x2e0   :  { %v587_v61 = vpop.f32.mrb[3].mxu0  ;;  %597 = vmatmul.mubr.msk.f32.vlgmr.msra.gmra.mrb[2].mxu1 %vm133_vm1, %v393_v60 }
 0x3b3   :  { %v478_v2 = vpop.f32.mrb[2].mxu1 }
 0x3b4   :  { %v479_v3 = vadd.f32 %v478_v2, %v407_v1  ;;  %v598_v4 = vpop.f32.mrb[3].mxu1 }
 0x3b6   :  { %482 = vst [vmem:[#allocation8] sm:$0x3] %v479_v3 }
 0x3b7   :  { %683 = shalt.err (!%p680_p3)
}
 0x3b8   :  { %s684_s7 = scalar_lea.hbm %s912_s8, 32 }
 0x3b9   :  { %p685_p4 = scmp.ne.s32.totalorder %s912_s8, %s684_s7  ;;  %p688_p5 = scmp.lt.u32.totalorder %s684_s7, %s912_s8 }
 0x3bb   :  { %p690_p6 = pnand %p688_p5, %p685_p4 }
 0x3bd   :  { %693 = shalt.err (!%p690_p6)
}
 0x3be   :  { %492 = dma.vmem_to_hbm [thread:$0]  %s490_s19, 32, %s912_s8, [#allocation5]  }
 0x3bf   :  { %698 = dma.done.wait [#allocation5], 32  }
 0x3c0   :  { %699 = vsyncadd [#allocation5], 4294967264 }
 0x3c1   :  { %496 = vsyncpa [#allocation4], 1 }
 0x3c2   :  { %497 = vsyncpa [#allocation5], 1 }
 0x3c3   :  { %498 = vsyncpa [#allocation6], 1 }

</bundles_post_ra>
